<compile_context>
chip_gen: v7x
topology: tpu7x:2x2x1
jax: 0.10.0
libtpu: 0.0.40
codegen_flags: <defaults>
</compile_context>

<pallas_src>
import functools

import jax
import jax.numpy as jnp
from jax.experimental import pallas as pl
from jax.experimental.pallas import tpu as pltpu


def _align8(n: int) -> int:
    return ((n + 7) // 8) * 8


def _pick_batch_tile(B: int) -> int:
    """Batch tile: pipelined blocks at training scale, single block at small B.

    Only tiles that divide B evenly are used (no ragged-tail handling needed);
    otherwise the whole batch is one block, which is still well within VMEM for
    SAC-scale shapes (e.g. 4096 x 256 f32 activations = 4 MiB).
    """
    for tb in (512, 256, 128):
        if B > tb and B % tb == 0:
            return tb
    return B


def _critic_kernel(state_ref, action_ref, pack_ref, o_ref, *,
                   sd, ad, H, off_a, off_w2, off_small):
    s = state_ref[...]            # [TB, sd]
    a = action_ref[...]           # [TB, ad]

    # Static slices of the VMEM-resident parameter slab (segment starts are
    # 8-row aligned so the slices stay cheap / tile-boundary friendly).
    w1_s = pack_ref[0:sd, :]                        # [sd, H]  fc1 rows hitting `state`
    w1_a = pack_ref[off_a:off_a + ad, :]            # [ad, H]  fc1 rows hitting `action`
    w2 = pack_ref[off_w2:off_w2 + H, :]             # [H, H]
    small = pack_ref[off_small:off_small + 8, :]    # rows: b1, b2, w3, b3(bcast), pad
    b1 = small[0:1, :]                              # [1, H]
    b2 = small[1:2, :]                              # [1, H]
    w3 = small[2:3, :]                              # [1, H]
    b3 = small[3:4, 0:1]                            # [1, 1]

    # fc1 (with fused concat) + relu -- MXU, f32 accumulate.
    h1 = (jnp.dot(s, w1_s, preferred_element_type=jnp.float32)
          + jnp.dot(a, w1_a, preferred_element_type=jnp.float32)
          + b1)
    h1 = jnp.maximum(h1, 0.0)

    # fc2 + relu
    h2 = jnp.dot(h1, w2, preferred_element_type=jnp.float32) + b2
    h2 = jnp.maximum(h2, 0.0)

    # fc3: output width 1 -> VPU multiply + XLU lane reduce.
    q = jnp.sum(h2 * w3, axis=-1, keepdims=True) + b3
    o_ref[...] = q.astype(o_ref.dtype)


@jax.jit
def critic_forward(state, action, pack):
    B, sd = state.shape
    ad = action.shape[-1]
    H = pack.shape[-1]
    off_a = _align8(sd)
    off_w2 = off_a + _align8(ad)
    off_small = off_w2 + _align8(H)
    TB = _pick_batch_tile(B)

    kernel = functools.partial(
        _critic_kernel, sd=sd, ad=ad, H=H,
        off_a=off_a, off_w2=off_w2, off_small=off_small)

    return pl.pallas_call(
        kernel,
        out_shape=jax.ShapeDtypeStruct((B, 1), jnp.float32),
        grid_spec=pltpu.PrefetchScalarGridSpec(
            num_scalar_prefetch=0,
            grid=(B // TB,),
            in_specs=[
                pl.BlockSpec((TB, sd), lambda i: (i, 0)),            # batch-tiled
                pl.BlockSpec((TB, ad), lambda i: (i, 0)),            # batch-tiled
                pl.BlockSpec((pack.shape[0], H), lambda i: (0, 0)),  # weights stay resident
            ],
            out_specs=pl.BlockSpec((TB, 1), lambda i: (i, 0)),
        ),
        compiler_params=pltpu.CompilerParams(
            dimension_semantics=("parallel",)),
    )(state, action, pack)


def init_critic_params(key, state_dim, action_dim, hidden=256):
    """nn.Linear-style U(-1/sqrt(fan_in), 1/sqrt(fan_in)); weights stored as (in, out)."""
    d_in = state_dim + action_dim
    keys = jax.random.split(key, 6)

    def lin(kw, kb, fan_in, fan_out):
        bound = 1.0 / jnp.sqrt(jnp.float32(fan_in))
        w = jax.random.uniform(kw, (fan_in, fan_out), jnp.float32, -bound, bound)
        b = jax.random.uniform(kb, (fan_out,), jnp.float32, -bound, bound)
        return w, b

    w1, b1 = lin(keys[0], keys[1], d_in, hidden)
    w2, b2 = lin(keys[2], keys[3], hidden, hidden)
    w3, b3 = lin(keys[4], keys[5], hidden, 1)
    return (w1, b1, w2, b2, w3, b3)


def pack_critic_params(params, state_dim, action_dim, hidden):
    """Pack all parameters into one [rows, hidden] f32 slab (done once, outside the forward).

    Row layout (segment starts 8-aligned):
      [0, sd)               : W1 rows multiplying `state`
      [off_a, off_a+ad)     : W1 rows multiplying `action`
      [off_w2, off_w2+H)    : W2
      off_small + 0         : b1
      off_small + 1         : b2
      off_small + 2         : W3 (fc3 weight, as a row)
      off_small + 3         : b3 broadcast across the row
    """
    w1, b1, w2, b2, w3, b3 = params
    sd, ad, H = state_dim, action_dim, hidden
    off_a = _align8(sd)
    off_w2 = off_a + _align8(ad)
    off_small = off_w2 + _align8(H)
    rows = off_small + 8

    pack = jnp.zeros((rows, H), jnp.float32)
    pack = pack.at[0:sd, :].set(w1[:sd, :])
    pack = pack.at[off_a:off_a + ad, :].set(w1[sd:, :])
    pack = pack.at[off_w2:off_w2 + H, :].set(w2)
    pack = pack.at[off_small + 0, :].set(b1)
    pack = pack.at[off_small + 1, :].set(b2)
    pack = pack.at[off_small + 2, :].set(w3[:, 0])
    pack = pack.at[off_small + 3, :].set(jnp.full((H,), b3[0], jnp.float32))
    return pack


def _reference_forward(state, action, params):
    """Pure-JAX reference of the PyTorch module."""
    w1, b1, w2, b2, w3, b3 = params
    x = jnp.concatenate([state, action], axis=-1)
    h1 = jnp.maximum(x @ w1 + b1, 0.0)
    h2 = jnp.maximum(h1 @ w2 + b2, 0.0)
    return h2 @ w3 + b3


if __name__ == "__main__":
    STATE_DIM, ACTION_DIM, HIDDEN = 12, 4, 32

    key = jax.random.PRNGKey(0)
    _, _, k_params = jax.random.split(key, 3)
    params = init_critic_params(k_params, STATE_DIM, ACTION_DIM, HIDDEN)
    pack = pack_critic_params(params, STATE_DIM, ACTION_DIM, HIDDEN)

    # Exercise both the single-block path (B=8) and the multi-block grid path (B=256 -> 2 tiles).
    for B in (8, 256):
        ks, ka = jax.random.split(jax.random.fold_in(key, B))
        state = jax.random.normal(ks, (B, STATE_DIM), jnp.float32)
        action = jax.random.normal(ka, (B, ACTION_DIM), jnp.float32)

        out = critic_forward(state, action, pack)
        jax.block_until_ready(out)

        ref = _reference_forward(state, action, params)
        assert out.shape == (B, 1), out.shape
        assert jnp.allclose(out, ref, atol=1e-4, rtol=1e-4), f"mismatch vs reference at B={B}"

    print("KERNEL_OK")
</pallas_src>

<mosaic_0001>
module attributes {stable_mosaic.version = 11 : i64} {
  func.func @_critic_kernel(%arg0: i32, %arg1: memref<8x12xf32, #tpu.memory_space<vmem>>, %arg2: memref<8x4xf32, #tpu.memory_space<vmem>>, %arg3: memref<64x32xf32, #tpu.memory_space<vmem>>, %arg4: memref<8x1xf32, #tpu.memory_space<vmem>>) attributes {dimension_semantics = [#tpu.dimension_semantics<parallel>], iteration_bounds = array<i64: 1>, scalar_prefetch = 0 : i64, scratch_operands = 0 : i64, tpu.core_type = #tpu.core_type<tc>, window_params = [{transform_indices = @transform_0, window_bounds = array<i64: 8, 12>}, {transform_indices = @transform_1, window_bounds = array<i64: 8, 4>}, {pipeline_mode = #tpu.pipeline_mode<synchronous>, transform_indices = @transform_2, window_bounds = array<i64: 64, 32>}, {transform_indices = @transform_3, window_bounds = array<i64: 8, 1>}]} {
    %c0 = arith.constant 0 : index
    %c0_0 = arith.constant 0 : index
    %0 = vector.load %arg1[%c0, %c0_0] : memref<8x12xf32, #tpu.memory_space<vmem>>, vector<8x12xf32>
    %c0_1 = arith.constant 0 : index
    %c0_2 = arith.constant 0 : index
    %1 = vector.load %arg2[%c0_1, %c0_2] : memref<8x4xf32, #tpu.memory_space<vmem>>, vector<8x4xf32>
    %c0_3 = arith.constant 0 : index
    %c0_4 = arith.constant 0 : index
    %2 = vector.load %arg3[%c0_3, %c0_4] : memref<64x32xf32, #tpu.memory_space<vmem>>, vector<12x32xf32>
    %c16 = arith.constant 16 : index
    %c0_5 = arith.constant 0 : index
    %3 = vector.load %arg3[%c16, %c0_5] : memref<64x32xf32, #tpu.memory_space<vmem>>, vector<4x32xf32>
    %c24 = arith.constant 24 : index
    %c0_6 = arith.constant 0 : index
    %4 = vector.load %arg3[%c24, %c0_6] : memref<64x32xf32, #tpu.memory_space<vmem>>, vector<32x32xf32>
    %c56 = arith.constant 56 : index
    %c0_7 = arith.constant 0 : index
    %5 = vector.load %arg3[%c56, %c0_7] : memref<64x32xf32, #tpu.memory_space<vmem>>, vector<8x32xf32>
    %6 = vector.extract_strided_slice %5 {offsets = [0, 0], sizes = [1, 32], strides = [1, 1]} : vector<8x32xf32> to vector<1x32xf32>
    %7 = vector.extract_strided_slice %5 {offsets = [1, 0], sizes = [1, 32], strides = [1, 1]} : vector<8x32xf32> to vector<1x32xf32>
    %8 = vector.extract_strided_slice %5 {offsets = [2, 0], sizes = [1, 32], strides = [1, 1]} : vector<8x32xf32> to vector<1x32xf32>
    %9 = vector.extract_strided_slice %5 {offsets = [3, 0], sizes = [1, 1], strides = [1, 1]} : vector<8x32xf32> to vector<1x1xf32>
    %cst = arith.constant dense<0.000000e+00> : vector<8x32xf32>
    %10 = tpu.matmul %0, %2, %cst {dimension_numbers = #tpu.dot_dimension_numbers<[1], [0], [0], [1], [0, 0, 1, 1], [], []>} : vector<8x12xf32>, vector<12x32xf32>, vector<8x32xf32> -> vector<8x32xf32>
    %cst_8 = arith.constant dense<0.000000e+00> : vector<8x32xf32>
    %11 = tpu.matmul %1, %3, %cst_8 {dimension_numbers = #tpu.dot_dimension_numbers<[1], [0], [0], [1], [0, 0, 1, 1], [], []>} : vector<8x4xf32>, vector<4x32xf32>, vector<8x32xf32> -> vector<8x32xf32>
    %12 = arith.addf %10, %11 : vector<8x32xf32>
    %13 = vector.broadcast %6 : vector<1x32xf32> to vector<8x32xf32>
    %14 = arith.addf %12, %13 : vector<8x32xf32>
    %cst_9 = arith.constant 0.000000e+00 : f32
    %15 = vector.broadcast %cst_9 : f32 to vector<8x32xf32>
    %16 = arith.maximumf %14, %15 : vector<8x32xf32>
    %cst_10 = arith.constant dense<0.000000e+00> : vector<8x32xf32>
    %17 = tpu.matmul %16, %4, %cst_10 {dimension_numbers = #tpu.dot_dimension_numbers<[1], [0], [0], [1], [0, 0, 1, 1], [], []>} : vector<8x32xf32>, vector<32x32xf32>, vector<8x32xf32> -> vector<8x32xf32>
    %18 = vector.broadcast %7 : vector<1x32xf32> to vector<8x32xf32>
    %19 = arith.addf %17, %18 : vector<8x32xf32>
    %cst_11 = arith.constant 0.000000e+00 : f32
    %20 = vector.broadcast %cst_11 : f32 to vector<8x32xf32>
    %21 = arith.maximumf %19, %20 : vector<8x32xf32>
    %22 = vector.broadcast %8 : vector<1x32xf32> to vector<8x32xf32>
    %23 = arith.mulf %21, %22 : vector<8x32xf32>
    %cst_12 = arith.constant dense<0.000000e+00> : vector<8xf32>
    %24 = vector.multi_reduction <add>, %23, %cst_12 [1] : vector<8x32xf32> to vector<8xf32>
    %25 = vector.shape_cast %24 : vector<8xf32> to vector<8x1xf32>
    %26 = vector.broadcast %9 : vector<1x1xf32> to vector<8x1xf32>
    %27 = arith.addf %25, %26 : vector<8x1xf32>
    %c0_13 = arith.constant 0 : index
    %c0_14 = arith.constant 0 : index
    %28 = vector.load %arg4[%c0_13, %c0_14] : memref<8x1xf32, #tpu.memory_space<vmem>>, vector<8x1xf32>
    tpu.vector_store %arg4[%c0_13, %c0_14], %27 {strides = array<i32>} : memref<8x1xf32, #tpu.memory_space<vmem>>, vector<8x1xf32>,
    return
  }
  func.func @transform_0(%arg0: i32) -> (i32, i32) {
    %c0_i32 = arith.constant 0 : i32
    %c0_i32_0 = arith.constant 0 : i32
    return %arg0, %c0_i32 : i32, i32
  }
  func.func @transform_1(%arg0: i32) -> (i32, i32) {
    %c0_i32 = arith.constant 0 : i32
    %c0_i32_0 = arith.constant 0 : i32
    return %arg0, %c0_i32 : i32, i32
  }
  func.func @transform_2(%arg0: i32) -> (i32, i32) {
    %c0_i32 = arith.constant 0 : i32
    %c0_i32_0 = arith.constant 0 : i32
    %c0_i32_1 = arith.constant 0 : i32
    return %c0_i32, %c0_i32_0 : i32, i32
  }
  func.func @transform_3(%arg0: i32) -> (i32, i32) {
    %c0_i32 = arith.constant 0 : i32
    %c0_i32_0 = arith.constant 0 : i32
    return %arg0, %c0_i32 : i32, i32
  }
}

</mosaic_0001>

<bundles_post_ra>
// kernel: critic_forward.1
= control target key start
LH: loop header
LB: loop body
LE: loop exit
PB: predicated region body
PF: predicated region fallthrough
CT: control target
= control target key end

     0   :  { %vm28_vm0 = vcmask 1043456   ;;  %v335_v0 = vmov 0.0   ;;  %vm336_vm1 = vmmov 0   ;;  %vm24_vm2 = vcmask 31744   ;;  %s395_s2 = inlined_call_operand.vmem [shape: f32[64,32], index: 2, kind: input, shape index: {}]   ;;  %s396_s1 = inlined_call_operand.vmem [shape: f32[8,4], index: 1, kind: input, shape index: {}]   ;;  %s397_s0 = inlined_call_operand.vmem [shape: f32[8,12], index: 0, kind: input, shape index: {}]   ;;  %s398_s3 = inlined_call_operand.vmem [shape: f32[8,1], index: 3, kind: output, shape index: {}]  }
   0x1   :  { %298 = vmatprep.subr.mxu1 %v335_v0  ;;  %v18_v1 = vld [vmem:[%s395_s2 + $0x10] sm:$0xf]  ;;  %300 = vmatprep.mubr.msk.f32.mxu1 %vm336_vm1, %v335_v0  ;;  %v15_v2 = vld [vmem:[%s396_s1] sm:$0xff]  ;;  %vm337_vm3 = vmmov 1   ;;  %v17_v4 = vld [vmem:[%s395_s2 + $0x8] sm:$0xf]  ;;  %v179_v14 = vlaneseq }
   0x2   :  { %299 = vmatpush3.msk.msra.mxu1 %vm28_vm0, %v18_v1  ;;  %vm323_vm4 = vmpackc.low %vm28_vm0, %vm337_vm3  ;;  %v16_v3 = vld [vmem:[%s395_s2] sm:$0xff]  ;;  %v338_v5 = vmov 0.0|0.0   ;;  %318 = vmatprep.mubr.msk.f32.mxu0 %vm336_vm1, %v335_v0  ;;  %vm102_vm5 = vcmask 97280   ;;  %v19_v8 = vld [vmem:[%s395_s2 + $0x18] sm:$0xff]  ;;  %vm189_vm6 = vcmask 261120   ;;  %vm277_vm7 = vcmask 7168  }
   0x3   :  { %325 = vmatprep.subr.bf16.mxu0 %v338_v5  ;;  %301 = vmatmul.mubr.msk.f32.vlgmr.msra.gmra.mrb[0].mxu1 %vm24_vm2, %v15_v2  ;;  %v322_v6 = vpack.c.bf16 %v17_v4, %v16_v3  ;;  %v14_v7 = vld [vmem:[%s397_s0] sm:$0xff]  ;;  %v21_v11 = vld [vmem:[%s395_s2 + $0x28] sm:$0xff]  ;;  %v22_v12 = vld [vmem:[%s395_s2 + $0x30] sm:$0xff]  ;;  %v180_v15 = vshrl.u32 %v179_v14, 7 }
   0x4   :  { %321 = vmatprep.subr.bf16.mxu1 %v338_v5  ;;  %307 = vmatprep.mubr.msk.f32.mxu1 %vm336_vm1, %v335_v0  ;;  %v20_v9 = vld [vmem:[%s395_s2 + $0x20] sm:$0xff]  ;;  %v329_v13 = vpack.c.bf16 %v22_v12, %v21_v11  ;;  %v23_v19 = vld [vmem:[%s395_s2 + $0x38] sm:$0xff] }
   0x5   :  { %324 = vmatpush3.bf16.msk.msra.mxu1 %vm323_vm4, %v322_v6  ;;  %v326_v10 = vpack.c.bf16 %v20_v9, %v19_v8  ;;  %v181_v17 = vsub.s32 0, %v180_v15  ;;  %v187_v26 = vsub.s32 1, %v180_v15  ;;  %v266_v28 = vsub.s32 2, %v180_v15 }
   0x6   :  { %v274_v36 = vsub.s32 3, %v180_v15 }
   0x7   :  { %327 = vmatpush3.bf16.msra.mxu0 %v326_v10  ;;  %v182_v20 = vrot.slane %v23_v19, %v181_v17  ;;  %v188_v27 = vrot.slane %v23_v19, %v187_v26  ;;  %v267_v32 = vrot.slane %v23_v19, %v266_v28 }
   0x8   :  { %308 = vmatmul.mubr.msk.f32.vlgmr.msra.gmra.mrb[2].mxu1 %vm102_vm5, %v14_v7  ;;  %328 = vmatprep.subr.bf16.mxu0 %v338_v5  ;;  %v275_v37 = vrot.slane %v23_v19, %v274_v36 }
   0xb   :  { %330 = vmatpush3.bf16.msra.mxu0 %v329_v13 }
  0xd6   :  { %v98_v16 = vpop.f32.mrb[0].mxu1 }
  0xd7   :  { %v302_v18 = vpop.f32.mrb[1].mxu1 }
  0xdb   :  { %v175_v21 = vpop.f32.mrb[2].mxu1 }
  0xdc   :  { %v176_v22 = vadd.f32 %v175_v21, %v98_v16  ;;  %v309_v23 = vpop.f32.mrb[3].mxu1 }
  0xde   :  { %v183_v24 = vadd.f32 %v182_v20, %v176_v22 }
  0xe0   :  { %v184_v25 = vmax.f32 %v183_v24, 0.0 }
  0xe2   :  { %319 = vmatmul.mubr.msk.f32.vlgmr.msra.gmra.mrb[0].mxu0 %vm189_vm6, %v184_v25 }
 0x1b5   :  { %v259_v29 = vpop.f32.mrb[0].mxu0 }
 0x1b6   :  { %v260_v30 = vadd.f32 %v259_v29, %v188_v27  ;;  %v320_v31 = vpop.f32.mrb[1].mxu0 }
 0x1b8   :  { %v263_v33 = vmax.f32 %v260_v30, 0.0 }
 0x1ba   :  { %v268_v34 = vmul.f32 %v267_v32, %v263_v33 }
 0x1bc   :  { %v269_v35 = vsel %vm189_vm6, %v268_v34, 0.0 }
 0x1bd   :  { %270 = vadd.xlane.f32.xlu0 %v269_v35 }
 0x24a   :  { %v271_v38 = vpop.xlane.xlu0 %270 }
 0x24b   :  { %v276_v39 = vadd.f32 %v275_v37, %v271_v38 }
 0x24d   :  { %278 = vst.msk [vmem:[%s398_s3] sm:$0xff] %vm277_vm7, %v276_v39 }

</bundles_post_ra>
